<compile_context>
chip_gen: v5e
topology: v5e:2x2
jax: 0.10.0
libtpu: 0.0.40
codegen_flags: <defaults>
</compile_context>

<pallas_src>
import functools
import math

import jax
import jax.numpy as jnp
from jax import lax
from jax.experimental import pallas as pl
from jax.experimental.pallas import tpu as pltpu


_VMEM_LIMIT = 64 * 1024 * 1024  # raise scoped VMEM (v5e default is only 16 MiB)


# ------------------------------ tiling helpers ------------------------------

def _round_up(x, m):
    return ((x + m - 1) // m) * m


def _pick_row_tile(n, block_rows):
    """Row tile <= block_rows, sublane-aligned, and >=2 grid steps when possible
    so v7x's two TensorCores both get work on the 'parallel' axis."""
    tm = min(block_rows, n)
    if n > 8 and pl.cdiv(n, tm) < 2:
        tm = min(n, _round_up(pl.cdiv(n, 2), 8))
    return tm


def _pick_head_group(num_heads, head_dim):
    """Smallest head group whose lane width (hg*head_dim) is a multiple of 128
    (lane-dense blocks, minimal live logits); fall back to all heads (block
    last dim == full d_model, which also satisfies the BlockSpec rule)."""
    for hg in range(1, num_heads + 1):
        if num_heads % hg == 0 and (hg * head_dim) % 128 == 0:
            return hg
    return num_heads


# ------------------------------ Pallas kernels ------------------------------

def _linear_kernel(x_ref, w_ref, b_ref, o_ref, *, compute_dtype):
    # x: (TM, Din); w: (Dout, Din) ALREADY in compute_dtype (PyTorch layout,
    # contracted on dim 1 -> no wrapper transpose); b: (1, Dout) f32.
    x = x_ref[...].astype(compute_dtype)
    acc = lax.dot_general(x, w_ref[...], (((1,), (1,)), ((), ())),
                          preferred_element_type=jnp.float32)
    o_ref[...] = (acc + b_ref[...]).astype(o_ref.dtype)


def _fused_qkv_kernel(x_ref, w_ref, b_ref, q_ref, k_ref, v_ref, *, compute_dtype):
    # x: (TM, Din); w: (3*D, Din) = [w_q; w_k; w_v] in compute_dtype; b: (1, 3*D) f32.
    x = x_ref[...].astype(compute_dtype)
    acc = lax.dot_general(x, w_ref[...], (((1,), (1,)), ((), ())),
                          preferred_element_type=jnp.float32)
    acc = acc + b_ref[...]
    d = q_ref.shape[-1]
    q_ref[...] = acc[:, :d].astype(q_ref.dtype)
    k_ref[...] = acc[:, d:2 * d].astype(k_ref.dtype)
    v_ref[...] = acc[:, 2 * d:].astype(v_ref.dtype)


def _attention_kernel(q_ref, k_ref, v_ref, *out_refs, heads, head_dim,
                      compute_dtype, return_weights):
    # Blocks: q (1, TQ, hg*Dh); k/v (1, Sk, hg*Dh); o (1, TQ, hg*Dh);
    #         optional weights (1, hg, TQ, Sk).
    if return_weights:
        o_ref, w_ref = out_refs
    else:
        (o_ref,) = out_refs

    dh = head_dim
    scale = 1.0 / math.sqrt(dh)
    # EUP approx reciprocal only in the low-precision path (keeps the f32 path
    # bit-tight against the reference; weights then sum to ~1 only approximately
    # in bf16 -- acceptable, documented).
    approx = jnp.dtype(compute_dtype) != jnp.dtype(jnp.float32)

    # Fold the softmax scale into q: TQ*hg*Dh multiplies instead of TQ*hg*Sk.
    q_all = (q_ref[0] * scale).astype(compute_dtype)      # (TQ, hg*Dh)
    k_all = k_ref[0].astype(compute_dtype)                # (Sk, hg*Dh)
    v_all = v_ref[0].astype(compute_dtype)                # (Sk, hg*Dh)

    out_cols = []
    for h in range(heads):                                # static unrolled loop
        cols = slice(h * dh, (h + 1) * dh)                # static lane slice
        logits = lax.dot_general(q_all[:, cols], k_all[:, cols],
                                 (((1,), (1,)), ((), ())),
                                 preferred_element_type=jnp.float32)  # (TQ, Sk)
        logits = logits - jnp.max(logits, axis=-1, keepdims=True)
        p = jnp.exp(logits)
        p = p * pl.reciprocal(jnp.sum(p, axis=-1, keepdims=True), approx=approx)
        if return_weights:
            w_ref[0, h] = p.astype(w_ref.dtype)
        out_cols.append(jnp.dot(p.astype(compute_dtype), v_all[:, cols],
                                preferred_element_type=jnp.float32))
    # Lane-dense (TQ, hg*Dh) store: hg*Dh is a multiple of 128 (or the full
    # d_model), so the writeback uses unmasked stores and no extra transpose.
    o_ref[0] = jnp.concatenate(out_cols, axis=-1).astype(o_ref.dtype)


# ------------------------------ Pallas wrappers ------------------------------

def linear(x2d, w, b, *, compute_dtype, out_dtype, block_rows=512):
    """y = x2d @ w.T + b (torch.nn.Linear). w: (Dout, Din) in compute_dtype."""
    n, d_in = x2d.shape
    d_out = w.shape[0]
    tm = _pick_row_tile(n, block_rows)
    return pl.pallas_call(
        functools.partial(_linear_kernel, compute_dtype=compute_dtype),
        grid=(pl.cdiv(n, tm),),
        in_specs=[
            pl.BlockSpec((tm, d_in), lambda i: (i, 0)),      # activation rows (pipelined)
            pl.BlockSpec((d_out, d_in), lambda i: (0, 0)),   # weight, VMEM-resident
            pl.BlockSpec((1, d_out), lambda i: (0, 0)),      # bias (f32)
        ],
        out_specs=pl.BlockSpec((tm, d_out), lambda i: (i, 0)),
        out_shape=jax.ShapeDtypeStruct((n, d_out), out_dtype),
        compiler_params=pltpu.CompilerParams(
            dimension_semantics=("parallel",),
            vmem_limit_bytes=_VMEM_LIMIT),
    )(x2d, w, b.reshape(1, d_out))


def fused_qkv_projection(x2d, w_qkv, b_qkv, *, compute_dtype, out_dtype,
                         block_rows=512):
    """One matmul for all three projections. w_qkv: (3*D, Din) in compute_dtype."""
    n, d_in = x2d.shape
    d_out3 = w_qkv.shape[0]
    d = d_out3 // 3
    tm = _pick_row_tile(n, block_rows)
    row_spec = pl.BlockSpec((tm, d), lambda i: (i, 0))
    out_struct = jax.ShapeDtypeStruct((n, d), out_dtype)
    return pl.pallas_call(
        functools.partial(_fused_qkv_kernel, compute_dtype=compute_dtype),
        grid=(pl.cdiv(n, tm),),
        in_specs=[
            pl.BlockSpec((tm, d_in), lambda i: (i, 0)),
            pl.BlockSpec((d_out3, d_in), lambda i: (0, 0)),
            pl.BlockSpec((1, d_out3), lambda i: (0, 0)),
        ],
        out_specs=(row_spec, row_spec, row_spec),
        out_shape=(out_struct, out_struct, out_struct),
        compiler_params=pltpu.CompilerParams(
            dimension_semantics=("parallel",),
            vmem_limit_bytes=_VMEM_LIMIT),
    )(x2d, w_qkv, b_qkv.reshape(1, d_out3))


def attention(q, k, v, *, num_heads, compute_dtype, out_dtype,
              return_weights=False, weights_dtype=None, block_q=256):
    """q: (B, Sq, D); k, v: (B, Sk, D) -> out (B, Sq, D)[, weights (B, H, Sq, Sk)]."""
    B, Sq, D = q.shape
    Sk = k.shape[1]
    dh = D // num_heads
    hg = _pick_head_group(num_heads, dh)
    n_hg = num_heads // hg
    lanes = hg * dh
    tq = min(block_q, Sq)

    q_spec = pl.BlockSpec((1, tq, lanes), lambda b, g, qi: (b, qi, g))
    # K/V block index does not depend on qi -> no re-DMA across the inner q axis.
    kv_spec = pl.BlockSpec((1, Sk, lanes), lambda b, g, qi: (b, 0, g))
    o_spec = pl.BlockSpec((1, tq, lanes), lambda b, g, qi: (b, qi, g))
    o_shape = jax.ShapeDtypeStruct((B, Sq, D), out_dtype)

    if return_weights:
        wdt = weights_dtype or compute_dtype
        out_specs = (o_spec,
                     pl.BlockSpec((1, hg, tq, Sk), lambda b, g, qi: (b, g, qi, 0)))
        out_shape = (o_shape, jax.ShapeDtypeStruct((B, num_heads, Sq, Sk), wdt))
    else:
        out_specs = o_spec
        out_shape = o_shape

    result = pl.pallas_call(
        functools.partial(_attention_kernel, heads=hg, head_dim=dh,
                          compute_dtype=compute_dtype,
                          return_weights=return_weights),
        grid=(B, n_hg, pl.cdiv(Sq, tq)),
        in_specs=[q_spec, kv_spec, kv_spec],
        out_specs=out_specs,
        out_shape=out_shape,
        compiler_params=pltpu.CompilerParams(
            dimension_semantics=("parallel", "parallel", "parallel"),
            vmem_limit_bytes=_VMEM_LIMIT),
    )(q, k, v)

    if return_weights:
        return result
    return result, None


# -------------------------- Module (params + forward) --------------------------

def xavier_uniform(key, shape):
    fan_out, fan_in = shape
    bound = math.sqrt(6.0 / (fan_in + fan_out))
    return jax.random.uniform(key, shape, jnp.float32, -bound, bound)


def init_mha_params(key, num_heads, d_model):
    assert d_model % num_heads == 0
    ks = jax.random.split(key, 4)
    params = {}
    for name, k in zip(("w_q", "w_k", "w_v", "w_out"), ks):
        params[name] = {
            "weight": xavier_uniform(k, (d_model, d_model)),
            "bias": jnp.zeros((d_model,), jnp.float32),
        }
    return params


def prepare_mha_params(params, *, compute_dtype=jnp.float32):
    """One-time prep: pre-concatenate the QKV weight slab and pre-cast weights to
    the MXU compute dtype (no per-call concat, no per-grid-step weight casts).
    Biases stay f32 (added to the f32 accumulator)."""
    w_qkv = jnp.concatenate([params["w_q"]["weight"],
                             params["w_k"]["weight"],
                             params["w_v"]["weight"]], axis=0).astype(compute_dtype)
    b_qkv = jnp.concatenate([params["w_q"]["bias"],
                             params["w_k"]["bias"],
                             params["w_v"]["bias"]], axis=0).astype(jnp.float32)
    return {
        "w_qkv": w_qkv,
        "b_qkv": b_qkv,
        "w_out": params["w_out"]["weight"].astype(compute_dtype),
        "b_out": params["w_out"]["bias"].astype(jnp.float32),
    }


def multi_head_attention(prepared, query, value=None, *, num_heads,
                         compute_dtype=jnp.float32, return_weights=True,
                         block_rows=512, block_q=256):
    """Mirrors MultiHeadAttention.forward with masks=None. query: (B, S, D) f32.
    Set return_weights=False in production when the weights are unused (the
    O(S^2) weights writeback dominates HBM traffic at real sizes)."""
    B, S, D = query.shape
    d = D
    w_qkv, b_qkv = prepared["w_qkv"], prepared["b_qkv"]

    if value is None:
        # Self-attention: one fused matmul for Q/K/V.
        q2d, k2d, v2d = fused_qkv_projection(
            query.reshape(B * S, D), w_qkv, b_qkv,
            compute_dtype=compute_dtype, out_dtype=compute_dtype,
            block_rows=block_rows)
        Sv = S
    else:
        # Cross-attention fallback: separate projections from slices of the slab.
        Sv = value.shape[1]
        q2d = linear(query.reshape(B * S, D), w_qkv[:d], b_qkv[:d],
                     compute_dtype=compute_dtype, out_dtype=compute_dtype,
                     block_rows=block_rows)
        k2d = linear(value.reshape(B * Sv, D), w_qkv[d:2 * d], b_qkv[d:2 * d],
                     compute_dtype=compute_dtype, out_dtype=compute_dtype,
                     block_rows=block_rows)
        v2d = linear(value.reshape(B * Sv, D), w_qkv[2 * d:], b_qkv[2 * d:],
                     compute_dtype=compute_dtype, out_dtype=compute_dtype,
                     block_rows=block_rows)

    # Lane-dense (B, S, D) activations end-to-end; the per-head split happens
    # inside the attention kernel via static column slices (no HBM transposes,
    # no (B, S, H, Dh) lane-sparse tensors).
    out3, weights = attention(q2d.reshape(B, S, D), k2d.reshape(B, Sv, D),
                              v2d.reshape(B, Sv, D),
                              num_heads=num_heads, compute_dtype=compute_dtype,
                              out_dtype=compute_dtype,
                              return_weights=return_weights, block_q=block_q)

    out = linear(out3.reshape(B * S, D), prepared["w_out"], prepared["b_out"],
                 compute_dtype=compute_dtype, out_dtype=jnp.float32,
                 block_rows=block_rows).reshape(B, S, D)
    return out, weights


# ------------------------------------ main ------------------------------------

if __name__ == "__main__":
    num_heads = 4
    d_model = 32
    batch = 2
    seq_len = 8

    key = jax.random.PRNGKey(0)
    k_params, k_x = jax.random.split(key)
    params = init_mha_params(k_params, num_heads, d_model)
    x = jax.random.normal(k_x, (batch, seq_len, d_model), jnp.float32)

    # Pure-JAX reference of the module semantics (masks=None).
    def ref(params, x):
        B, S, D = x.shape
        Dh = D // num_heads
        q = x.reshape(B * S, D) @ params["w_q"]["weight"].T + params["w_q"]["bias"]
        k = x.reshape(B * S, D) @ params["w_k"]["weight"].T + params["w_k"]["bias"]
        v = x.reshape(B * S, D) @ params["w_v"]["weight"].T + params["w_v"]["bias"]
        q = q.reshape(B, S, num_heads, Dh).transpose(0, 2, 1, 3)
        k = k.reshape(B, S, num_heads, Dh).transpose(0, 2, 1, 3)
        v = v.reshape(B, S, num_heads, Dh).transpose(0, 2, 1, 3)
        logits = jnp.einsum("bhqd,bhkd->bhqk", q, k) / math.sqrt(Dh)
        w = jax.nn.softmax(logits, axis=-1)
        o = jnp.einsum("bhqk,bhkd->bhqd", w, v)
        o = o.transpose(0, 2, 1, 3).reshape(B, S, D)
        o = o.reshape(B * S, D) @ params["w_out"]["weight"].T + params["w_out"]["bias"]
        return o.reshape(B, S, D), w

    ref_out, ref_w = ref(params, x)

    # ---- f32 path (exact check against the reference) ----
    prepared32 = prepare_mha_params(params, compute_dtype=jnp.float32)
    fwd_f32 = jax.jit(functools.partial(multi_head_attention,
                                        num_heads=num_heads,
                                        compute_dtype=jnp.float32))
    out32, w32 = jax.block_until_ready(fwd_f32(prepared32, x))
    assert out32.shape == (batch, seq_len, d_model)
    assert w32.shape == (batch, num_heads, seq_len, seq_len)
    assert jnp.allclose(out32, ref_out, atol=1e-4, rtol=1e-4)
    assert jnp.allclose(w32, ref_w, atol=1e-4, rtol=1e-4)

    # ---- bf16 MXU fast path (f32 accumulation; bf16 intermediates/weights) ----
    prepared16 = prepare_mha_params(params, compute_dtype=jnp.bfloat16)
    fwd_bf16 = jax.jit(functools.partial(multi_head_attention,
                                         num_heads=num_heads,
                                         compute_dtype=jnp.bfloat16))
    out16, w16 = jax.block_until_ready(fwd_bf16(prepared16, x))
    assert out16.shape == (batch, seq_len, d_model)
    assert w16.shape == (batch, num_heads, seq_len, seq_len)
    assert jnp.allclose(out16, ref_out, atol=5e-2, rtol=5e-2)
    assert jnp.allclose(w16.astype(jnp.float32), ref_w, atol=5e-2, rtol=5e-2)

    print("KERNEL_OK")
</pallas_src>

<mosaic_0001>
module attributes {stable_mosaic.version = 11 : i64} {
  func.func @_fused_qkv_kernel(%arg0: i32, %arg1: memref<8x32xf32, #tpu.memory_space<vmem>>, %arg2: memref<96x32xf32, #tpu.memory_space<vmem>>, %arg3: memref<1x96xf32, #tpu.memory_space<vmem>>, %arg4: memref<8x32xf32, #tpu.memory_space<vmem>>, %arg5: memref<8x32xf32, #tpu.memory_space<vmem>>, %arg6: memref<8x32xf32, #tpu.memory_space<vmem>>) attributes {dimension_semantics = [#tpu.dimension_semantics<parallel>], iteration_bounds = array<i64: 2>, scalar_prefetch = 0 : i64, scratch_operands = 0 : i64, tpu.core_type = #tpu.core_type<tc>, window_params = [{transform_indices = @transform_0, window_bounds = array<i64: 8, 32>}, {pipeline_mode = #tpu.pipeline_mode<synchronous>, transform_indices = @transform_1, window_bounds = array<i64: 96, 32>}, {pipeline_mode = #tpu.pipeline_mode<synchronous>, transform_indices = @transform_2, window_bounds = array<i64: 1, 96>}, {transform_indices = @transform_3, window_bounds = array<i64: 8, 32>}, {transform_indices = @transform_4, window_bounds = array<i64: 8, 32>}, {transform_indices = @transform_5, window_bounds = array<i64: 8, 32>}]} {
    %c0 = arith.constant 0 : index
    %c0_0 = arith.constant 0 : index
    %0 = vector.load %arg1[%c0, %c0_0] : memref<8x32xf32, #tpu.memory_space<vmem>>, vector<8x32xf32>
    %c0_1 = arith.constant 0 : index
    %c0_2 = arith.constant 0 : index
    %1 = vector.load %arg2[%c0_1, %c0_2] : memref<96x32xf32, #tpu.memory_space<vmem>>, vector<96x32xf32>
    %cst = arith.constant dense<0.000000e+00> : vector<8x96xf32>
    %2 = tpu.matmul %0, %1, %cst {dimension_numbers = #tpu.dot_dimension_numbers<[1], [1], [0], [0], [0, 0, 1, 0], [], []>} : vector<8x32xf32>, vector<96x32xf32>, vector<8x96xf32> -> vector<8x96xf32>
    %c0_3 = arith.constant 0 : index
    %c0_4 = arith.constant 0 : index
    %3 = vector.load %arg3[%c0_3, %c0_4] : memref<1x96xf32, #tpu.memory_space<vmem>>, vector<1x96xf32>
    %4 = vector.broadcast %3 : vector<1x96xf32> to vector<8x96xf32>
    %5 = arith.addf %2, %4 : vector<8x96xf32>
    %6 = vector.extract_strided_slice %5 {offsets = [0, 0], sizes = [8, 32], strides = [1, 1]} : vector<8x96xf32> to vector<8x32xf32>
    %c0_5 = arith.constant 0 : index
    %c0_6 = arith.constant 0 : index
    %7 = vector.load %arg4[%c0_5, %c0_6] : memref<8x32xf32, #tpu.memory_space<vmem>>, vector<8x32xf32>
    tpu.vector_store %arg4[%c0_5, %c0_6], %6 {strides = array<i32>} : memref<8x32xf32, #tpu.memory_space<vmem>>, vector<8x32xf32>,
    %8 = vector.extract_strided_slice %5 {offsets = [0, 32], sizes = [8, 32], strides = [1, 1]} : vector<8x96xf32> to vector<8x32xf32>
    %c0_7 = arith.constant 0 : index
    %c0_8 = arith.constant 0 : index
    %9 = vector.load %arg5[%c0_7, %c0_8] : memref<8x32xf32, #tpu.memory_space<vmem>>, vector<8x32xf32>
    tpu.vector_store %arg5[%c0_7, %c0_8], %8 {strides = array<i32>} : memref<8x32xf32, #tpu.memory_space<vmem>>, vector<8x32xf32>,
    %10 = vector.extract_strided_slice %5 {offsets = [0, 64], sizes = [8, 32], strides = [1, 1]} : vector<8x96xf32> to vector<8x32xf32>
    %c0_9 = arith.constant 0 : index
    %c0_10 = arith.constant 0 : index
    %11 = vector.load %arg6[%c0_9, %c0_10] : memref<8x32xf32, #tpu.memory_space<vmem>>, vector<8x32xf32>
    tpu.vector_store %arg6[%c0_9, %c0_10], %10 {strides = array<i32>} : memref<8x32xf32, #tpu.memory_space<vmem>>, vector<8x32xf32>,
    return
  }
  func.func @transform_0(%arg0: i32) -> (i32, i32) {
    %c0_i32 = arith.constant 0 : i32
    %c0_i32_0 = arith.constant 0 : i32
    return %arg0, %c0_i32 : i32, i32
  }
  func.func @transform_1(%arg0: i32) -> (i32, i32) {
    %c0_i32 = arith.constant 0 : i32
    %c0_i32_0 = arith.constant 0 : i32
    %c0_i32_1 = arith.constant 0 : i32
    return %c0_i32, %c0_i32_0 : i32, i32
  }
  func.func @transform_2(%arg0: i32) -> (i32, i32) {
    %c0_i32 = arith.constant 0 : i32
    %c0_i32_0 = arith.constant 0 : i32
    %c0_i32_1 = arith.constant 0 : i32
    return %c0_i32, %c0_i32_0 : i32, i32
  }
  func.func @transform_3(%arg0: i32) -> (i32, i32) {
    %c0_i32 = arith.constant 0 : i32
    %c0_i32_0 = arith.constant 0 : i32
    return %arg0, %c0_i32 : i32, i32
  }
  func.func @transform_4(%arg0: i32) -> (i32, i32) {
    %c0_i32 = arith.constant 0 : i32
    %c0_i32_0 = arith.constant 0 : i32
    return %arg0, %c0_i32 : i32, i32
  }
  func.func @transform_5(%arg0: i32) -> (i32, i32) {
    %c0_i32 = arith.constant 0 : i32
    %c0_i32_0 = arith.constant 0 : i32
    return %arg0, %c0_i32 : i32, i32
  }
}

module attributes {stable_mosaic.version = 11 : i64} {
  func.func @_linear_kernel(%arg0: i32, %arg1: memref<8x32xf32, #tpu.memory_space<vmem>>, %arg2: memref<32x32xf32, #tpu.memory_space<vmem>>, %arg3: memref<1x32xf32, #tpu.memory_space<vmem>>, %arg4: memref<8x32xf32, #tpu.memory_space<vmem>>) attributes {dimension_semantics = [#tpu.dimension_semantics<parallel>], iteration_bounds = array<i64: 2>, scalar_prefetch = 0 : i64, scratch_operands = 0 : i64, tpu.core_type = #tpu.core_type<tc>, window_params = [{transform_indices = @transform_0, window_bounds = array<i64: 8, 32>}, {pipeline_mode = #tpu.pipeline_mode<synchronous>, transform_indices = @transform_1, window_bounds = array<i64: 32, 32>}, {pipeline_mode = #tpu.pipeline_mode<synchronous>, transform_indices = @transform_2, window_bounds = array<i64: 1, 32>}, {transform_indices = @transform_3, window_bounds = array<i64: 8, 32>}]} {
    %c0 = arith.constant 0 : index
    %c0_0 = arith.constant 0 : index
    %0 = vector.load %arg1[%c0, %c0_0] : memref<8x32xf32, #tpu.memory_space<vmem>>, vector<8x32xf32>
    %c0_1 = arith.constant 0 : index
    %c0_2 = arith.constant 0 : index
    %1 = vector.load %arg2[%c0_1, %c0_2] : memref<32x32xf32, #tpu.memory_space<vmem>>, vector<32x32xf32>
    %cst = arith.constant dense<0.000000e+00> : vector<8x32xf32>
    %2 = tpu.matmul %0, %1, %cst {dimension_numbers = #tpu.dot_dimension_numbers<[1], [1], [0], [0], [0, 0, 1, 0], [], []>} : vector<8x32xf32>, vector<32x32xf32>, vector<8x32xf32> -> vector<8x32xf32>
    %c0_3 = arith.constant 0 : index
    %c0_4 = arith.constant 0 : index
    %3 = vector.load %arg3[%c0_3, %c0_4] : memref<1x32xf32, #tpu.memory_space<vmem>>, vector<1x32xf32>
    %4 = vector.broadcast %3 : vector<1x32xf32> to vector<8x32xf32>
    %5 = arith.addf %2, %4 : vector<8x32xf32>
    %c0_5 = arith.constant 0 : index
    %c0_6 = arith.constant 0 : index
    %6 = vector.load %arg4[%c0_5, %c0_6] : memref<8x32xf32, #tpu.memory_space<vmem>>, vector<8x32xf32>
    tpu.vector_store %arg4[%c0_5, %c0_6], %5 {strides = array<i32>} : memref<8x32xf32, #tpu.memory_space<vmem>>, vector<8x32xf32>,
    return
  }
  func.func @transform_0(%arg0: i32) -> (i32, i32) {
    %c0_i32 = arith.constant 0 : i32
    %c0_i32_0 = arith.constant 0 : i32
    return %arg0, %c0_i32 : i32, i32
  }
  func.func @transform_1(%arg0: i32) -> (i32, i32) {
    %c0_i32 = arith.constant 0 : i32
    %c0_i32_0 = arith.constant 0 : i32
    %c0_i32_1 = arith.constant 0 : i32
    return %c0_i32, %c0_i32_0 : i32, i32
  }
  func.func @transform_2(%arg0: i32) -> (i32, i32) {
    %c0_i32 = arith.constant 0 : i32
    %c0_i32_0 = arith.constant 0 : i32
    %c0_i32_1 = arith.constant 0 : i32
    return %c0_i32, %c0_i32_0 : i32, i32
  }
  func.func @transform_3(%arg0: i32) -> (i32, i32) {
    %c0_i32 = arith.constant 0 : i32
    %c0_i32_0 = arith.constant 0 : i32
    return %arg0, %c0_i32 : i32, i32
  }
}

module attributes {stable_mosaic.version = 11 : i64} {
  func.func @_attention_kernel(%arg0: i32, %arg1: i32, %arg2: i32, %arg3: memref<1x8x32xf32, #tpu.memory_space<vmem>>, %arg4: memref<1x8x32xf32, #tpu.memory_space<vmem>>, %arg5: memref<1x8x32xf32, #tpu.memory_space<vmem>>, %arg6: memref<1x8x32xf32, #tpu.memory_space<vmem>>, %arg7: memref<1x4x8x8xf32, #tpu.memory_space<vmem>>) attributes {dimension_semantics = [#tpu.dimension_semantics<parallel>, #tpu.dimension_semantics<parallel>, #tpu.dimension_semantics<parallel>], iteration_bounds = array<i64: 2, 1, 1>, scalar_prefetch = 0 : i64, scratch_operands = 0 : i64, tpu.core_type = #tpu.core_type<tc>, window_params = [{transform_indices = @transform_0, window_bounds = array<i64: 1, 8, 32>}, {transform_indices = @transform_1, window_bounds = array<i64: 1, 8, 32>}, {transform_indices = @transform_2, window_bounds = array<i64: 1, 8, 32>}, {transform_indices = @transform_3, window_bounds = array<i64: 1, 8, 32>}, {transform_indices = @transform_4, window_bounds = array<i64: 1, 4, 8, 8>}]} {
    %c0 = arith.constant 0 : index
    %c0_0 = arith.constant 0 : index
    %c0_1 = arith.constant 0 : index
    %0 = vector.load %arg3[%c0, %c0_0, %c0_1] : memref<1x8x32xf32, #tpu.memory_space<vmem>>, vector<1x8x32xf32>
    %1 = vector.shape_cast %0 : vector<1x8x32xf32> to vector<8x32xf32>
    %cst = arith.constant 0.353553385 : f32
    %2 = vector.broadcast %cst : f32 to vector<8x32xf32>
    %3 = arith.mulf %1, %2 : vector<8x32xf32>
    %c0_2 = arith.constant 0 : index
    %c0_3 = arith.constant 0 : index
    %c0_4 = arith.constant 0 : index
    %4 = vector.load %arg4[%c0_2, %c0_3, %c0_4] : memref<1x8x32xf32, #tpu.memory_space<vmem>>, vector<1x8x32xf32>
    %5 = vector.shape_cast %4 : vector<1x8x32xf32> to vector<8x32xf32>
    %c0_5 = arith.constant 0 : index
    %c0_6 = arith.constant 0 : index
    %c0_7 = arith.constant 0 : index
    %6 = vector.load %arg5[%c0_5, %c0_6, %c0_7] : memref<1x8x32xf32, #tpu.memory_space<vmem>>, vector<1x8x32xf32>
    %7 = vector.shape_cast %6 : vector<1x8x32xf32> to vector<8x32xf32>
    %8 = vector.extract_strided_slice %3 {offsets = [0, 0], sizes = [8, 8], strides = [1, 1]} : vector<8x32xf32> to vector<8x8xf32>
    %9 = vector.extract_strided_slice %5 {offsets = [0, 0], sizes = [8, 8], strides = [1, 1]} : vector<8x32xf32> to vector<8x8xf32>
    %cst_8 = arith.constant dense<0.000000e+00> : vector<8x8xf32>
    %10 = tpu.matmul %8, %9, %cst_8 {dimension_numbers = #tpu.dot_dimension_numbers<[1], [1], [0], [0], [0, 0, 1, 0], [], []>} : vector<8x8xf32>, vector<8x8xf32>, vector<8x8xf32> -> vector<8x8xf32>
    %cst_9 = arith.constant dense<0xFF800000> : vector<8xf32>
    %11 = vector.multi_reduction <maximumf>, %10, %cst_9 [1] : vector<8x8xf32> to vector<8xf32>
    %12 = vector.shape_cast %11 : vector<8xf32> to vector<8x1xf32>
    %13 = vector.broadcast %12 : vector<8x1xf32> to vector<8x8xf32>
    %14 = arith.subf %10, %13 : vector<8x8xf32>
    %15 = math.exp %14 : vector<8x8xf32>
    %cst_10 = arith.constant dense<0.000000e+00> : vector<8xf32>
    %16 = vector.multi_reduction <add>, %15, %cst_10 [1] : vector<8x8xf32> to vector<8xf32>
    %17 = vector.shape_cast %16 : vector<8xf32> to vector<8x1xf32>
    %18 = tpu.reciprocal %17 : vector<8x1xf32> -> vector<8x1xf32>
    %19 = vector.broadcast %18 : vector<8x1xf32> to vector<8x8xf32>
    %20 = arith.mulf %15, %19 : vector<8x8xf32>
    %c0_11 = arith.constant 0 : index
    %c0_12 = arith.constant 0 : index
    %c0_13 = arith.constant 0 : index
    %c0_14 = arith.constant 0 : index
    %21 = vector.load %arg7[%c0_11, %c0_12, %c0_13, %c0_14] : memref<1x4x8x8xf32, #tpu.memory_space<vmem>>, vector<1x1x8x8xf32>
    %22 = vector.shape_cast %21 : vector<1x1x8x8xf32> to vector<8x8xf32>
    %23 = vector.shape_cast %20 : vector<8x8xf32> to vector<1x1x8x8xf32>
    tpu.vector_store %arg7[%c0_11, %c0_12, %c0_13, %c0_14], %23 {strides = array<i32>} : memref<1x4x8x8xf32, #tpu.memory_space<vmem>>, vector<1x1x8x8xf32>,
    %24 = vector.extract_strided_slice %7 {offsets = [0, 0], sizes = [8, 8], strides = [1, 1]} : vector<8x32xf32> to vector<8x8xf32>
    %cst_15 = arith.constant dense<0.000000e+00> : vector<8x8xf32>
    %25 = tpu.matmul %20, %24, %cst_15 {dimension_numbers = #tpu.dot_dimension_numbers<[1], [0], [0], [1], [0, 0, 1, 1], [], []>} : vector<8x8xf32>, vector<8x8xf32>, vector<8x8xf32> -> vector<8x8xf32>
    %26 = vector.extract_strided_slice %3 {offsets = [0, 8], sizes = [8, 8], strides = [1, 1]} : vector<8x32xf32> to vector<8x8xf32>
    %27 = vector.extract_strided_slice %5 {offsets = [0, 8], sizes = [8, 8], strides = [1, 1]} : vector<8x32xf32> to vector<8x8xf32>
    %cst_16 = arith.constant dense<0.000000e+00> : vector<8x8xf32>
    %28 = tpu.matmul %26, %27, %cst_16 {dimension_numbers = #tpu.dot_dimension_numbers<[1], [1], [0], [0], [0, 0, 1, 0], [], []>} : vector<8x8xf32>, vector<8x8xf32>, vector<8x8xf32> -> vector<8x8xf32>
    %cst_17 = arith.constant dense<0xFF800000> : vector<8xf32>
    %29 = vector.multi_reduction <maximumf>, %28, %cst_17 [1] : vector<8x8xf32> to vector<8xf32>
    %30 = vector.shape_cast %29 : vector<8xf32> to vector<8x1xf32>
    %31 = vector.broadcast %30 : vector<8x1xf32> to vector<8x8xf32>
    %32 = arith.subf %28, %31 : vector<8x8xf32>
    %33 = math.exp %32 : vector<8x8xf32>
    %cst_18 = arith.constant dense<0.000000e+00> : vector<8xf32>
    %34 = vector.multi_reduction <add>, %33, %cst_18 [1] : vector<8x8xf32> to vector<8xf32>
    %35 = vector.shape_cast %34 : vector<8xf32> to vector<8x1xf32>
    %36 = tpu.reciprocal %35 : vector<8x1xf32> -> vector<8x1xf32>
    %37 = vector.broadcast %36 : vector<8x1xf32> to vector<8x8xf32>
    %38 = arith.mulf %33, %37 : vector<8x8xf32>
    %c0_19 = arith.constant 0 : index
    %c1 = arith.constant 1 : index
    %c0_20 = arith.constant 0 : index
    %c0_21 = arith.constant 0 : index
    %39 = vector.load %arg7[%c0_19, %c1, %c0_20, %c0_21] : memref<1x4x8x8xf32, #tpu.memory_space<vmem>>, vector<1x1x8x8xf32>
    %40 = vector.shape_cast %39 : vector<1x1x8x8xf32> to vector<8x8xf32>
    %41 = vector.shape_cast %38 : vector<8x8xf32> to vector<1x1x8x8xf32>
    tpu.vector_store %arg7[%c0_19, %c1, %c0_20, %c0_21], %41 {strides = array<i32>} : memref<1x4x8x8xf32, #tpu.memory_space<vmem>>, vector<1x1x8x8xf32>,
    %42 = vector.extract_strided_slice %7 {offsets = [0, 8], sizes = [8, 8], strides = [1, 1]} : vector<8x32xf32> to vector<8x8xf32>
    %cst_22 = arith.constant dense<0.000000e+00> : vector<8x8xf32>
    %43 = tpu.matmul %38, %42, %cst_22 {dimension_numbers = #tpu.dot_dimension_numbers<[1], [0], [0], [1], [0, 0, 1, 1], [], []>} : vector<8x8xf32>, vector<8x8xf32>, vector<8x8xf32> -> vector<8x8xf32>
    %44 = vector.extract_strided_slice %3 {offsets = [0, 16], sizes = [8, 8], strides = [1, 1]} : vector<8x32xf32> to vector<8x8xf32>
    %45 = vector.extract_strided_slice %5 {offsets = [0, 16], sizes = [8, 8], strides = [1, 1]} : vector<8x32xf32> to vector<8x8xf32>
    %cst_23 = arith.constant dense<0.000000e+00> : vector<8x8xf32>
    %46 = tpu.matmul %44, %45, %cst_23 {dimension_numbers = #tpu.dot_dimension_numbers<[1], [1], [0], [0], [0, 0, 1, 0], [], []>} : vector<8x8xf32>, vector<8x8xf32>, vector<8x8xf32> -> vector<8x8xf32>
    %cst_24 = arith.constant dense<0xFF800000> : vector<8xf32>
    %47 = vector.multi_reduction <maximumf>, %46, %cst_24 [1] : vector<8x8xf32> to vector<8xf32>
    %48 = vector.shape_cast %47 : vector<8xf32> to vector<8x1xf32>
    %49 = vector.broadcast %48 : vector<8x1xf32> to vector<8x8xf32>
    %50 = arith.subf %46, %49 : vector<8x8xf32>
    %51 = math.exp %50 : vector<8x8xf32>
    %cst_25 = arith.constant dense<0.000000e+00> : vector<8xf32>
    %52 = vector.multi_reduction <add>, %51, %cst_25 [1] : vector<8x8xf32> to vector<8xf32>
    %53 = vector.shape_cast %52 : vector<8xf32> to vector<8x1xf32>
    %54 = tpu.reciprocal %53 : vector<8x1xf32> -> vector<8x1xf32>
    %55 = vector.broadcast %54 : vector<8x1xf32> to vector<8x8xf32>
    %56 = arith.mulf %51, %55 : vector<8x8xf32>
    %c0_26 = arith.constant 0 : index
    %c2 = arith.constant 2 : index
    %c0_27 = arith.constant 0 : index
    %c0_28 = arith.constant 0 : index
    %57 = vector.load %arg7[%c0_26, %c2, %c0_27, %c0_28] : memref<1x4x8x8xf32, #tpu.memory_space<vmem>>, vector<1x1x8x8xf32>
    %58 = vector.shape_cast %57 : vector<1x1x8x8xf32> to vector<8x8xf32>
    %59 = vector.shape_cast %56 : vector<8x8xf32> to vector<1x1x8x8xf32>
    tpu.vector_store %arg7[%c0_26, %c2, %c0_27, %c0_28], %59 {strides = array<i32>} : memref<1x4x8x8xf32, #tpu.memory_space<vmem>>, vector<1x1x8x8xf32>,
    %60 = vector.extract_strided_slice %7 {offsets = [0, 16], sizes = [8, 8], strides = [1, 1]} : vector<8x32xf32> to vector<8x8xf32>
    %cst_29 = arith.constant dense<0.000000e+00> : vector<8x8xf32>
    %61 = tpu.matmul %56, %60, %cst_29 {dimension_numbers = #tpu.dot_dimension_numbers<[1], [0], [0], [1], [0, 0, 1, 1], [], []>} : vector<8x8xf32>, vector<8x8xf32>, vector<8x8xf32> -> vector<8x8xf32>
    %62 = vector.extract_strided_slice %3 {offsets = [0, 24], sizes = [8, 8], strides = [1, 1]} : vector<8x32xf32> to vector<8x8xf32>
    %63 = vector.extract_strided_slice %5 {offsets = [0, 24], sizes = [8, 8], strides = [1, 1]} : vector<8x32xf32> to vector<8x8xf32>
    %cst_30 = arith.constant dense<0.000000e+00> : vector<8x8xf32>
    %64 = tpu.matmul %62, %63, %cst_30 {dimension_numbers = #tpu.dot_dimension_numbers<[1], [1], [0], [0], [0, 0, 1, 0], [], []>} : vector<8x8xf32>, vector<8x8xf32>, vector<8x8xf32> -> vector<8x8xf32>
    %cst_31 = arith.constant dense<0xFF800000> : vector<8xf32>
    %65 = vector.multi_reduction <maximumf>, %64, %cst_31 [1] : vector<8x8xf32> to vector<8xf32>
    %66 = vector.shape_cast %65 : vector<8xf32> to vector<8x1xf32>
    %67 = vector.broadcast %66 : vector<8x1xf32> to vector<8x8xf32>
    %68 = arith.subf %64, %67 : vector<8x8xf32>
    %69 = math.exp %68 : vector<8x8xf32>
    %cst_32 = arith.constant dense<0.000000e+00> : vector<8xf32>
    %70 = vector.multi_reduction <add>, %69, %cst_32 [1] : vector<8x8xf32> to vector<8xf32>
    %71 = vector.shape_cast %70 : vector<8xf32> to vector<8x1xf32>
    %72 = tpu.reciprocal %71 : vector<8x1xf32> -> vector<8x1xf32>
    %73 = vector.broadcast %72 : vector<8x1xf32> to vector<8x8xf32>
    %74 = arith.mulf %69, %73 : vector<8x8xf32>
    %c0_33 = arith.constant 0 : index
    %c3 = arith.constant 3 : index
    %c0_34 = arith.constant 0 : index
    %c0_35 = arith.constant 0 : index
    %75 = vector.load %arg7[%c0_33, %c3, %c0_34, %c0_35] : memref<1x4x8x8xf32, #tpu.memory_space<vmem>>, vector<1x1x8x8xf32>
    %76 = vector.shape_cast %75 : vector<1x1x8x8xf32> to vector<8x8xf32>
    %77 = vector.shape_cast %74 : vector<8x8xf32> to vector<1x1x8x8xf32>
    tpu.vector_store %arg7[%c0_33, %c3, %c0_34, %c0_35], %77 {strides = array<i32>} : memref<1x4x8x8xf32, #tpu.memory_space<vmem>>, vector<1x1x8x8xf32>,
    %78 = vector.extract_strided_slice %7 {offsets = [0, 24], sizes = [8, 8], strides = [1, 1]} : vector<8x32xf32> to vector<8x8xf32>
    %cst_36 = arith.constant dense<0.000000e+00> : vector<8x8xf32>
    %79 = tpu.matmul %74, %78, %cst_36 {dimension_numbers = #tpu.dot_dimension_numbers<[1], [0], [0], [1], [0, 0, 1, 1], [], []>} : vector<8x8xf32>, vector<8x8xf32>, vector<8x8xf32> -> vector<8x8xf32>
    %80 = tpu.concatenate %25, %43, %61, %79 in 1 : vector<8x8xf32>, vector<8x8xf32>, vector<8x8xf32>, vector<8x8xf32> -> vector<8x32xf32>
    %c0_37 = arith.constant 0 : index
    %c0_38 = arith.constant 0 : index
    %c0_39 = arith.constant 0 : index
    %81 = vector.load %arg6[%c0_37, %c0_38, %c0_39] : memref<1x8x32xf32, #tpu.memory_space<vmem>>, vector<1x8x32xf32>
    %82 = vector.shape_cast %81 : vector<1x8x32xf32> to vector<8x32xf32>
    %83 = vector.shape_cast %80 : vector<8x32xf32> to vector<1x8x32xf32>
    tpu.vector_store %arg6[%c0_37, %c0_38, %c0_39], %83 {strides = array<i32>} : memref<1x8x32xf32, #tpu.memory_space<vmem>>, vector<1x8x32xf32>,
    return
  }
  func.func @transform_0(%arg0: i32, %arg1: i32, %arg2: i32) -> (i32, i32, i32) {
    %c0_i32 = arith.constant 0 : i32
    return %arg0, %arg2, %arg1 : i32, i32, i32
  }
  func.func @transform_1(%arg0: i32, %arg1: i32, %arg2: i32) -> (i32, i32, i32) {
    %c0_i32 = arith.constant 0 : i32
    %c0_i32_0 = arith.constant 0 : i32
    return %arg0, %c0_i32, %arg1 : i32, i32, i32
  }
  func.func @transform_2(%arg0: i32, %arg1: i32, %arg2: i32) -> (i32, i32, i32) {
    %c0_i32 = arith.constant 0 : i32
    %c0_i32_0 = arith.constant 0 : i32
    return %arg0, %c0_i32, %arg1 : i32, i32, i32
  }
  func.func @transform_3(%arg0: i32, %arg1: i32, %arg2: i32) -> (i32, i32, i32) {
    %c0_i32 = arith.constant 0 : i32
    return %arg0, %arg2, %arg1 : i32, i32, i32
  }
  func.func @transform_4(%arg0: i32, %arg1: i32, %arg2: i32) -> (i32, i32, i32, i32) {
    %c0_i32 = arith.constant 0 : i32
    %c0_i32_0 = arith.constant 0 : i32
    return %arg0, %arg1, %arg2, %c0_i32 : i32, i32, i32, i32
  }
}

</mosaic_0001>

<bundles_post_ra>
// kernel: multi_head_attention.3
= control target key start
LH: loop header
LB: loop body
LE: loop exit
PB: predicated region body
PF: predicated region fallthrough
CT: control target
= control target key end

     0   :  { %s518_s18 = smov 0   ;;  %s596_s0 = inlined_call_operand.vmem [shape: f32[16,32], index: 0, kind: input, shape index: {}]   ;;  %s597_s1 = inlined_call_operand.vmem [shape: f32[96,32], index: 1, kind: input, shape index: {}]   ;;  %s598_s2 = inlined_call_operand.vmem [shape: f32[1,96], index: 2, kind: input, shape index: {}]   ;;  %s599_s3 = inlined_call_operand.vmem [shape: f32[16,32], index: 3, kind: output, shape index: {0}]   ;;  %s600_s4 = inlined_call_operand.vmem [shape: f32[16,32], index: 4, kind: output, shape index: {1}]   ;;  %s601_s5 = inlined_call_operand.vmem [shape: f32[16,32], index: 5, kind: output, shape index: {2}]  }
   0x1 LB: > { %s443_s19 = sadd.s32 4294967295, %s484_s18   ;;  %p447_p0 = scmp.ge.s32.totalorder %s484_s18, 1  ;;  %s484_s18 = sphi %s518_s18, %s16_s18  }
   0x2   : > { %p191_p1 = scmp.lt.s32.totalorder %s484_s18, 3 }
   0x4   : > { %p192_p2 = pnand %p447_p0, %p191_p1 }
   0x5   : > { %p225_p3 = scmp.lt.s32.totalorder (!%p192_p2), %s443_s19, 1  ;;  %s486_s29 = smov (!%p192_p2), 96  }
   0x6   : > { %195 = sbr.rel (%p192_p2) target bundleno = 311 (0x137), region = 32  ;;  %s487_s30 = smov (!%p192_p2), 64  }
   0xb   : > { %v253_v0 = vld [vmem:[%s597_s1 + $0x58] sm:$0xff]  ;;  %vm258_vm0 = vcmask 261120   ;;  %v252_v1 = vld [vmem:[%s597_s1 + $0x50] sm:$0xff]  ;;  %v251_v2 = vld [vmem:[%s597_s1 + $0x48] sm:$0xff]  ;;  %s603_s19 = smov (!%p225_p3, %s443_s19), 1 }
   0xc   : > { %452 = vmatpush.xpose.msk.msra.mxu0 %vm258_vm0, %v253_v0  ;;  %v250_v3 = vld [vmem:[%s597_s1 + $0x40] sm:$0xff]  ;;  %v249_v4 = vld [vmem:[%s597_s1 + $0x38] sm:$0xff]  ;;  %v248_v5 = vld [vmem:[%s597_s1 + $0x30] sm:$0xff]  ;;  %s448_s17 = sshll.u32 %s603_s19, 3 }
   0xd   : > { %v247_v6 = vld [vmem:[%s597_s1 + $0x28] sm:$0xff]  ;;  %v246_v7 = vld [vmem:[%s597_s1 + $0x20] sm:$0xff]  ;;  %v245_v8 = vld [vmem:[%s597_s1 + $0x18] sm:$0xff]  ;;  %s228_s24 = scalar_lea.vmem %s596_s0, %s448_s17  ;;  %s232_s28 = scalar_lea.vmem %s599_s3, %s448_s17 }
   0xe   : > { %v244_v9 = vld [vmem:[%s597_s1 + $0x10] sm:$0xff]  ;;  %v243_v10 = vld [vmem:[%s597_s1 + $0x8] sm:$0xff]  ;;  %v242_v11 = vld [vmem:[%s597_s1] sm:$0xff]  ;;  %s236_s8 = scalar_lea.vmem %s600_s4, %s448_s17  ;;  %s240_s11 = scalar_lea.vmem %s601_s5, %s448_s17 }
   0xf   : > { %v241_v12 = vld [vmem:[%s228_s24] sm:$0xff] }
  0x10   : > { %453 = vmatpush.xpose.msk.msra.mxu0 %vm258_vm0, %v252_v1  ;;  %v477_v13 = vld [vmem:[%s598_s2] ss:$0 sm:$0xff] }
  0x14   : > { %454 = vmatpush.xpose.msk.msra.mxu0 %vm258_vm0, %v251_v2 }
  0x18   : > { %455 = vmatpush.xpose.msk.msra.mxu0 %vm258_vm0, %v250_v3 }
  0x1c   : > { %456 = vmatpush.xpose.msk.msra.mxu0 %vm258_vm0, %v249_v4 }
  0x20   : > { %457 = vmatpush.xpose.msk.msra.mxu0 %vm258_vm0, %v248_v5 }
  0x24   : > { %458 = vmatpush.xpose.msk.msra.mxu0 %vm258_vm0, %v247_v6 }
  0x28   : > { %459 = vmatpush.xpose.msk.msra.mxu0 %vm258_vm0, %v246_v7 }
  0x2c   : > { %460 = vmatpush.xpose.msk.msra.mxu0 %vm258_vm0, %v245_v8 }
  0x30   : > { %461 = vmatpush.xpose.msk.msra.mxu0 %vm258_vm0, %v244_v9 }
  0x34   : > { %462 = vmatpush.xpose.msk.msra.mxu0 %vm258_vm0, %v243_v10 }
  0x38   : > { %463 = vmatpush.xpose.msk.msra.mxu0 %vm258_vm0, %v242_v11 }
  0x3b   : > { %464 = vmatmul.msk.f32.vlgmr.msra.gmra.mxu0 %vm258_vm0, %v241_v12 }
  0xb8   : > { %v315_v14 = vpop.f32.mrf.mxu0 }
  0xb9   : > { %v316_v15 = vadd.f32 %v477_v13, %v315_v14 }
  0xbb   : > { %318 = vst.msk [vmem:[%s232_s28] sm:$0xff] %vm258_vm0, %v316_v15  ;;  %320 = vrot.lane.b32.xlu0 %v316_v15, %s486_s29 }
  0xc3   : > { %324 = vrot.lane.b32.xlu0 %v316_v15, %s487_s30 }
 0x12d   : > { %v321_v16 = vpop.permute.xlu0 %320 }
 0x12e   : > { %323 = vst.msk [vmem:[%s236_s8] sm:$0xff] %vm258_vm0, %v321_v16 }
 0x135   : > { %v325_v17 = vpop.permute.xlu0 %324 }
 0x136   : > { %327 = vst.msk [vmem:[%s240_s11] sm:$0xff] %vm258_vm0, %v325_v17 }
 0x137 PF: > { %s16_s18 = sadd.s32 1, %s484_s18  }
 0x138   : > { %p13_p4 = scmp.ge.s32.totalorder %s16_s18, 4  }
 0x13a   :  { %15 = sbr.rel (!%p13_p4) target bundleno = 1 (0x1), region = 86 }

// kernel: multi_head_attention.5
= control target key start
LH: loop header
LB: loop body
LE: loop exit
PB: predicated region body
PF: predicated region fallthrough
CT: control target
= control target key end

     0   :  { %8 = vsyncpa [#allocation3], 0  ;;  %s532_s0 = inlined_call_operand.vmem [shape: f32[16,32], index: 0, kind: input, shape index: {}]   ;;  %s533_s1 = inlined_call_operand.vmem [shape: f32[32,32], index: 1, kind: input, shape index: {}]   ;;  %s534_s2 = inlined_call_operand.vmem [shape: f32[1,32], index: 2, kind: input, shape index: {}]   ;;  %s535_s3 = inlined_call_operand.hbm [shape: f32[16,32], index: 3, kind: output, shape index: {}]  }
   0x1   :  { %10 = vsyncpa [#allocation3 + $0x1], 0  ;;  %s426_s12 = smov 0   ;;  %s428_s13 = smov 0  }
   0x2   :  { %s430_s14 = smov 0   ;;  %s432_s15 = smov 0  }
   0x3 LB: > { %s447_s16 = sadd.s32 4294967295, %s404_s15   ;;  %s287_s17 = sadd.s32 4294967294, %s404_s15   ;;  %s404_s15 = sphi %s432_s15, %s541_s15   ;;  %s400_s14 = sphi %s430_s14, %s540_s14   ;;  %s396_s13 = sphi %s428_s13, %s539_s13   ;;  %s392_s12 = sphi %s426_s12, %s538_s12  }
   0x4   : > { %s451_s18 = sadd.s32 1, %s404_s15   ;;  %s91_s19 = sadd.s32 1, %s400_s14 }
   0x5   : > { %s88_s20 = ssub.s32 %s404_s15, %s451_s18  ;;  %p101_p0 = scmp.ne.s32.totalorder %s400_s14, %s396_s13 }
   0x6   : > { %p89_p1 = scmp.eq.s32.totalorder %s88_s20, 0  ;;  %p102_p2 = scmp.eq.s32.totalorder %s447_s16, 1 }
   0x7   : > { %p107_p3 = scmp.ne.s32.totalorder %s396_s13, %s392_s12  ;;  %p108_p4 = scmp.eq.s32.totalorder %s287_s17, 1 }
   0x8   : > { %s462_s21 = scalar_select %p89_p1, %s400_s14, %s91_s19  }
   0x9   : > { %p464_p5 = por %p102_p2, %p101_p0  ;;  %p468_p6 = por %p108_p4, %p107_p3 }
   0xa   : > { %p290_p7 = scmp.ge.s32.totalorder %s404_s15, 1  ;;  %p139_p8 = scmp.lt.s32.totalorder %s404_s15, 3 }
   0xc   : > { %p140_p9 = pnand %p290_p7, %p139_p8 }
   0xd   : > { %p162_p10 = scmp.lt.s32.totalorder (!%p140_p9), %s447_s16, 1  ;;  %s159_s10 = sand.u32 (!%p140_p9), 1, %s396_s13  }
   0xe   : > { %143 = sbr.rel (%p140_p9) target bundleno = 166 (0xa6), region = 32  ;;  %s291_s11 = sshll.u32 (!%p140_p9), %s159_s10, 3 }
   0xf   : > { %s299_s17 = sshll.u32 (!%p140_p9), %s447_s16, 3  ;;  %s161_s27 = scalar_lea.vmem (!%p140_p9), [#allocation2], %s291_s11 }
  0x10   : > { %s223_s24 = scalar_lea.hbm (!%p140_p9), %s535_s3, %s299_s17  ;;  %s213_s30 = scalar_lea.sflag (!%p140_p9), [#allocation3], %s159_s10 }
  0x11   : > { %s227_s29 = sshll.u32 (!%p140_p9), %s223_s24, 4  ;;  %s362_s7 = scalar_lea.hbm (!%p140_p9), %s535_s3, 16  ;;  %s228_s29 = int_to_ptr.hbm [resolvable:$true] %s227_s29 }
  0x13   : > { %v170_v0 = vld [vmem:[%s533_s1 + $0x18] sm:$0xff]  ;;  %vm175_vm0 = vcmask 261120   ;;  %v169_v1 = vld [vmem:[%s533_s1 + $0x10] sm:$0xff]  ;;  %s163_s28 = scalar_select %p162_p10, %s447_s16, 1  ;;  %v168_v2 = vld [vmem:[%s533_s1 + $0x8] sm:$0xff] }
  0x14   : > { %293 = vmatpush.xpose.msk.msra.mxu0 %vm175_vm0, %v170_v0  ;;  %v167_v3 = vld [vmem:[%s533_s1] sm:$0xff]  ;;  %s356_s16 = sshra.s32 %s228_s29, 4  ;;  %s357_s16 = int_to_ptr.hbm [resolvable:$true] %s356_s16 }
  0x15   : > { %s292_s4 = sshll.u32 %s163_s28, 3  ;;  %v341_v5 = vld [vmem:[%s534_s2] ss:$0 sm:$0xff]  ;;  %s225_s28 = sshll.u32 %s161_s27, 4  ;;  %s226_s28 = int_to_ptr.vmem [resolvable:$true] %s225_s28 }
  0x16   : > { %s165_s9 = scalar_lea.vmem %s532_s0, %s292_s4  ;;  %s358_s4 = scalar_lea.hbm %s357_s16, 8 }
  0x17   : > { %v166_v4 = vld [vmem:[%s165_s9] sm:$0xff]  ;;  %p359_p11 = scmp.ne.s32.totalorder %s357_s16, %s358_s4  ;;  %p363_p0 = scmp.lt.s32.totalorder %s357_s16, %s535_s3 }
  0x18   : > { %294 = vmatpush.xpose.msk.msra.mxu0 %vm175_vm0, %v169_v1  ;;  %p364_p1 = scmp.lt.s32.totalorder %s362_s7, %s358_s4 }
  0x19   : > { %p360_p12 = pnand %p359_p11, %p464_p5 }
  0x1a   : > { %p365_p2 = por %p364_p1, %p363_p0 }
  0x1b   : > { %p361_p13 = pneg %p360_p12 }
  0x1c   : > { %295 = vmatpush.xpose.msk.msra.mxu0 %vm175_vm0, %v168_v2 }
  0x1d   : > { %p366_p3 = pnand %p365_p2, %p361_p13 }
  0x20   : > { %296 = vmatpush.xpose.msk.msra.mxu0 %vm175_vm0, %v167_v3 }
  0x23   : > { %297 = vmatmul.msk.f32.vlgmr.msra.gmra.mxu0 %vm175_vm0, %v166_v4 }
  0xa0   : > { %v208_v6 = vpop.f32.mrf.mxu0 }
  0xa1   : > { %v209_v7 = vadd.f32 %v341_v5, %v208_v6 }
  0xa3   : > { %211 = vst.msk [vmem:[%s161_s27] sm:$0xff] %vm175_vm0, %v209_v7 }
  0xa4   : > { %369 = shalt.err (!%p366_p3)
}
  0xa5   : > { %302 = dma.vmem_to_hbm [thread:$0]  (%p464_p5), %s226_s28, 128, %s228_s29, %s213_s30  }
  0xa6 PF: > { %p308_p4 = scmp.ge.s32.totalorder %s404_s15, 2  ;;  %s239_s10 = sand.u32 1, %s392_s12  }
  0xa7   : > { %s240_s11 = scalar_lea.sflag [#allocation3], %s239_s10 }
  0xa8   : > { %p305_p7 = pnand %p308_p4, %p468_p6 }
  0xaa   : > { %p306_p8 = pneg %p305_p7 }
  0xac   : > { %387 = dma.done.wait (%p306_p8), %s240_s11, 128  }
  0xad   : > { %389 = vsyncadd (%p306_p8), %s240_s11, 4294967168  ;;  %p13_p9 = scmp.ge.s32.totalorder %s451_s18, 4   ;;  %s538_s12 = smov %s396_s13 }
  0xae   : > { %s539_s13 = smov %s400_s14  ;;  %s540_s14 = smov %s462_s21 }
  0xaf   : > { %s541_s15 = smov %s451_s18  ;;  %15 = sbr.rel (!%p13_p9) target bundleno = 3 (0x3), region = 67 }
  0xb4   :  { %246 = vsyncpa [#allocation3], 1 }
  0xb5   :  { %248 = vsyncpa [#allocation3 + $0x1], 1 }

// kernel: multi_head_attention.4
= control target key start
LH: loop header
LB: loop body
LE: loop exit
PB: predicated region body
PF: predicated region fallthrough
CT: control target
= control target key end

     0   :  { %10 = vsyncpa [#allocation3], 0  ;;  %s1231_s0 = inlined_call_operand.vmem [shape: f32[2,8,32], index: 0, kind: input, shape index: {}]   ;;  %s1232_s1 = inlined_call_operand.vmem [shape: f32[2,8,32], index: 1, kind: input, shape index: {}]   ;;  %s1233_s2 = inlined_call_operand.vmem [shape: f32[2,8,32], index: 2, kind: input, shape index: {}]   ;;  %s1234_s3 = inlined_call_operand.vmem [shape: f32[2,8,32], index: 3, kind: output, shape index: {0}]   ;;  %s1235_s4 = inlined_call_operand.hbm [shape: f32[2,4,8,8], index: 4, kind: output, shape index: {1}]  }
   0x1   :  { %12 = vsyncpa [#allocation3 + $0x1], 0  ;;  %s1065_s15 = smov 0   ;;  %s1067_s16 = smov 0  }
   0x2   :  { %s1069_s17 = smov 0   ;;  %s1071_s18 = smov 0  }
   0x3   :  { %s1073_s19 = smov 0   ;;  %s1075_s20 = smov 0  }
   0x4 LB: > { %s844_s21 = sadd.s32 4294967295, %s1031_s20   ;;  %s845_s22 = sadd.s32 4294967294, %s1031_s20   ;;  %s1031_s20 = sphi %s1075_s20, %s18_s20   ;;  %s1027_s19 = sphi %s1073_s19, %s1242_s19   ;;  %s1023_s18 = sphi %s1071_s18, %s1241_s18   ;;  %s1019_s17 = sphi %s1069_s17, %s1240_s17   ;;  %s1015_s16 = sphi %s1067_s16, %s1239_s16   ;;  %s1011_s15 = sphi %s1065_s15, %s1238_s15  }
   0x5   : > { %s37_s23 = sadd.s32 1, %s1027_s19  ;;  %s164_s24 = sadd.s32 1, %s1019_s17 }
   0x6   : > { %p39_p0 = scmp.ge.s32.totalorder %s37_s23, 2  ;;  %p174_p1 = scmp.ne.s32.totalorder %s1019_s17, %s1015_s16 }
   0x7   : > { %p175_p2 = scmp.eq.s32.totalorder %s844_s21, 1  ;;  %p180_p3 = scmp.ne.s32.totalorder %s1015_s16, %s1011_s15 }
   0x8   : > { %s1244_s23 = smov (%p39_p0, %s37_s23), 0  ;;  %p181_p5 = scmp.eq.s32.totalorder %s845_s22, 1 }
   0x9   : > { %p1105_p4 = por %p175_p2, %p174_p1  ;;  %s157_s26 = ssub.s32 %s1027_s19, %s1244_s23 }
   0xa   : > { %p848_p6 = scmp.ge.s32.totalorder %s1031_s20, 1  ;;  %p162_p7 = scmp.eq.s32.totalorder %s157_s26, 0 }
   0xb   : > { %p1112_p8 = por %p181_p5, %p180_p3  ;;  %p232_p9 = scmp.lt.s32.totalorder %s1031_s20, 3 }
   0xc   : > { %s1118_s28 = scalar_select %p162_p7, %s1019_s17, %s164_s24  }
   0xd   : > { %p233_p10 = pnand %p848_p6, %p232_p9 }
   0xe   : > { %p287_p11 = scmp.lt.s32.totalorder (!%p233_p10), %s1023_s18, 1  ;;  %s1033_s11 = smov (!%p233_p10), 120  }
   0xf   : > { %236 = sbr.rel (%p233_p10) target bundleno = 1066 (0x42a), region = 32  ;;  %s1034_s12 = smov (!%p233_p10), 112  }
  0x10   : > { %s1035_s13 = smov (!%p233_p10), 104   ;;  %s284_s24 = sand.u32 (!%p233_p10), 1, %s1015_s16  }
  0x11   : > { %s849_s26 = sshll.u32 (!%p233_p10), %s284_s24, 5  ;;  %s1036_s5 = smov (!%p233_p10), 24  }
  0x12   : > { %s874_s6 = sshll.u32 (!%p233_p10), %s1023_s18, 5 }
  0x13   : > { %s689_s9 = scalar_lea.hbm (!%p233_p10), %s1235_s4, %s874_s6 }
  0x14   : > { %s288_s29 = scalar_select %p287_p11, %s1023_s18, 1  ;;  %vm326_vm0 = vcmask 64512  }
  0x16   : > { %s1122_s30 = sshll.u32 %s288_s29, 3  ;;  %s1162_s29 = scalar_lea.vmem [#allocation2], %s849_s26 }
  0x17   : > { %s303_s7 = scalar_lea.vmem %s1232_s1, %s1122_s30  ;;  %s296_s10 = scalar_lea.vmem %s1231_s0, %s1122_s30 }
  0x18   : > { %v324_v0 = vld [vmem:[%s303_s7] sm:$0xff]  ;;  %s310_s22 = scalar_lea.vmem %s1233_s2, %s1122_s30  ;;  %s973_s26 = scalar_lea.hbm %s1235_s4, 64 }
  0x19   : > { %v322_v1 = vld [vmem:[%s296_s10] sm:$0xff]  ;;  %854 = vmatpush.xpose.msk.msra.mxu0 %vm326_vm0, %v324_v0  ;;  %403 = vrot.lane.b32.xlu1 %v324_v0, %s1033_s11  ;;  %s690_s10 = sshll.u32 %s1162_s29, 4  ;;  %s691_s10 = int_to_ptr.vmem [resolvable:$true] %s690_s10 }
  0x1a   : > { %v323_v2 = vmul.f32 0.35355338, %v322_v1  ;;  %484 = vrot.lane.b32.xlu2 %v324_v0, %s1034_s12  ;;  %v1151_v17 = vld [vmem:[%s310_s22] sm:$0xff] }
  0x1b   : > { %396 = vmatpush.msra.mxu1 %v1151_v17 }
  0x1c   : > { %855 = vmatmul.msk.f32.vlgmr.msra.gmra.mxu0 %vm326_vm0, %v323_v2 }
  0x21   : > { %401 = vrot.lane.b32.xlu1 %v323_v2, %s1033_s11 }
  0x22   : > { %564 = vrot.lane.b32.xlu2 %v324_v0, %s1035_s13 }
  0x29   : > { %562 = vrot.lane.b32.xlu1 %v323_v2, %s1035_s13 }
  0x74   : > { %v485_v7 = vpop.permute.xlu2 %484 }
  0x75   : > { %861 = vmatpush.xpose.msk.msrb.mxu1 %vm326_vm0, %v485_v7 }
  0x7c   : > { %v565_v8 = vpop.permute.xlu2 %564 }
  0x7d   : > { %865 = vmatpush.xpose.msk.msrb.mxu0 %vm326_vm0, %v565_v8 }
  0x8b   : > { %v404_v3 = vpop.permute.xlu1 %403 }
  0x8c   : > { %857 = vmatpush.xpose.msk.msra.mxu2 %vm326_vm0, %v404_v3 }
  0x93   : > { %v402_v4 = vpop.permute.xlu1 %401 }
  0x94   : > { %858 = vmatmul.msk.f32.vlgmr.msra.gmra.mxu2 %vm326_vm0, %v402_v4 }
  0x99   : > { %v350_v5 = vpop.f32.mrf.mxu0 }
  0x9a   : > { %v353_v6 = vsel %vm326_vm0, %v350_v5, -inf }
  0x9b   : > { %354 = vmax.xlane.f32.xlu0 %v353_v6  ;;  %v563_v9 = vpop.permute.xlu1 %562 }
  0x9c   : > { %866 = vmatmul.msk.f32.vlgmr.msrb.gmra.mxu0 %vm326_vm0, %v563_v9 }
 0x10e   : > { %v355_v10 = vpop.xlane.xlu0 %354 }
 0x10f   : > { %v356_v11 = vsub.f32 %v350_v5, %v355_v10 }
 0x111   : > { %v357_v12 = vmul.f32 1.442695, %v356_v11 }
 0x113   : > { %937 = vpow2.f32 %v357_v12 }
 0x117   : > { %v426_v13 = vpop.f32.mrf.mxu2 }
 0x118   : > { %v429_v14 = vsel %vm326_vm0, %v426_v13, -inf }
 0x119   : > { %v938_v15 = vpop.eup %937  ;;  %430 = vmax.xlane.f32.xlu2 %v429_v14  ;;  %v587_v18 = vpop.f32.mrf.mxu0 }
 0x11a   : > { %v359_v16 = vsel %vm326_vm0, %v938_v15, 0.0  ;;  %v590_v19 = vsel %vm326_vm0, %v587_v18, -inf }
 0x11b   : > { %360 = vadd.xlane.f32.xlu0 %v359_v16 }
 0x12f   : > { %482 = vrot.lane.b32.xlu0 %v323_v2, %s1034_s12 }
 0x159   : > { %591 = vmax.xlane.f32.xlu0 %v590_v19 }
 0x16d   : > { %616 = vrot.lane.b32.xlu0 %v1151_v17, %s1035_s13  ;;  %s672_s13 = scalar_lea.sflag [#allocation3], %s284_s24 }
 0x18c   : > { %v431_v20 = vpop.xlane.xlu2 %430 }
 0x18d   : > { %v432_v21 = vsub.f32 %v426_v13, %v431_v20 }
 0x18e   : > { %v361_v22 = vpop.xlane.xlu0 %360 }
 0x18f   : > { %939 = vrcp.f32 %v361_v22  ;;  %v433_v23 = vmul.f32 1.442695, %v432_v21  ;;  %v373_v29 = vand.u32 2147483648, %v361_v22  ;;  %v371_v31 = vand.u32 2147483647, %v361_v22 }
 0x190   : > { %vm367_vm2 = vweird.f32 %v361_v22 }
 0x191   : > { %941 = vpow2.f32 %v433_v23  ;;  %v374_v33 = vor.u32 1.1754944e-38, %v373_v29  ;;  %vm372_vm4 = vcmp.eq.f32.partialorder %v371_v31, 8.507059e+37 }
 0x195   : > { %v940_v24 = vpop.eup %939 }
 0x196   : > { %v363_v25 = vmul.f32 %v940_v24, %v361_v22  ;;  %vm368_vm1 = vweird.f32 %v940_v24 }
 0x197   : > { %v942_v26 = vpop.eup %941  ;;  %vm369_vm3 = vmor %vm367_vm2, %vm368_vm1 }
 0x198   : > { %v364_v27 = vsub.f32 1.0, %v363_v25  ;;  %v435_v28 = vsel %vm326_vm0, %v942_v26, 0.0 }
 0x199   : > { %436 = vadd.xlane.f32.xlu2 %v435_v28 }
 0x19a   : > { %v365_v30 = vmul.f32 %v940_v24, %v364_v27 }
 0x19c   : > { %v366_v32 = vadd.f32 %v940_v24, %v365_v30 }
 0x19e   : > { %v370_v34 = vsel %vm369_vm3, %v940_v24, %v366_v32 }
 0x19f   : > { %v375_v35 = vsel %vm372_vm4, %v374_v33, %v370_v34 }
 0x1a0   : > { %v376_v36 = vmul.f32 %v938_v15, %v375_v35 }
 0x1a1   : > { %v483_v37 = vpop.permute.xlu0 %482 }
 0x1a2   : > { %377 = vst.msk [vmem:[%s1162_s29] sm:$0xff] %vm326_vm0, %v376_v36  ;;  %856 = vmatmul.msk.f32.vlgmr.msra.gmra.mxu1 %vm326_vm0, %v376_v36 }
 0x1aa   : > { %862 = vmatmul.msk.f32.vlgmr.msrb.gmra.mxu1 %vm326_vm0, %v483_v37 }
 0x1cc   : > { %v592_v47 = vpop.xlane.xlu0 %591 }
 0x1cd   : > { %v593_v51 = vsub.f32 %v587_v18, %v592_v47 }
 0x1cf   : > { %v594_v53 = vmul.f32 1.442695, %v593_v51 }
 0x1df   : > { %v617_v58 = vpop.permute.xlu0 %616 }
 0x1e0   : > { %637 = vmatpush.msrb.mxu2 %v617_v58 }
 0x20c   : > { %v437_v38 = vpop.xlane.xlu2 %436 }
 0x20d   : > { %943 = vrcp.f32 %v437_v38  ;;  %v449_v41 = vand.u32 2147483648, %v437_v38  ;;  %vm443_vm5 = vweird.f32 %v437_v38  ;;  %v447_v43 = vand.u32 2147483647, %v437_v38 }
 0x20e   : > { %945 = vpow2.f32 %v594_v53 }
 0x20f   : > { %v450_v45 = vor.u32 1.1754944e-38, %v449_v41  ;;  %vm448_vm8 = vcmp.eq.f32.partialorder %v447_v43, 8.507059e+37 }
 0x213   : > { %v944_v39 = vpop.eup %943 }
 0x214   : > { %v439_v40 = vmul.f32 %v944_v39, %v437_v38  ;;  %vm444_vm6 = vweird.f32 %v944_v39  ;;  %v946_v56 = vpop.eup %945 }
 0x215   : > { %vm445_vm7 = vmor %vm443_vm5, %vm444_vm6  ;;  %v596_v57 = vsel %vm326_vm0, %v946_v56, 0.0 }
 0x216   : > { %v440_v42 = vsub.f32 1.0, %v439_v40 }
 0x218   : > { %v441_v44 = vmul.f32 %v944_v39, %v440_v42 }
 0x21a   : > { %v442_v46 = vadd.f32 %v944_v39, %v441_v44 }
 0x21c   : > { %v446_v48 = vsel %vm445_vm7, %v944_v39, %v442_v46 }
 0x21d   : > { %v451_v49 = vsel %vm448_vm8, %v450_v45, %v446_v48 }
 0x21e   : > { %v452_v50 = vmul.f32 %v942_v26, %v451_v49 }
 0x21f   : > { %v1168_v52 = vpop.f32.mrf.mxu1 }
 0x220   : > { %859 = vst.msk [vmem:[%s1162_s29 + $0x8] sm:$0xff] %vm326_vm0, %v452_v50 }
 0x227   : > { %v507_v54 = vpop.f32.mrf.mxu1 }
 0x228   : > { %v510_v55 = vsel %vm326_vm0, %v507_v54, -inf }
 0x229   : > { %511 = vmax.xlane.f32.xlu1 %v510_v55 }
 0x231   : > { %597 = vadd.xlane.f32.xlu1 %v596_v57 }
 0x24a   : > { %536 = vrot.lane.b32.xlu1 %v1151_v17, %s1034_s12  ;;  %s1037_s12 = smov 8  }
 0x29c   : > { %v512_v59 = vpop.xlane.xlu1 %511 }
 0x29d   : > { %v513_v60 = vsub.f32 %v507_v54, %v512_v59 }
 0x29f   : > { %v514_v61 = vmul.f32 1.442695, %v513_v60 }
 0x2a1   : > { %947 = vpow2.f32 %v514_v61 }
 0x2a4   : > { %v598_v62 = vpop.xlane.xlu1 %597 }
 0x2a5   : > { %949 = vrcp.f32 %v598_v62  ;;  %v610_v4 = vand.u32 2147483648, %v598_v62  ;;  %v608_v6 = vand.u32 2147483647, %v598_v62  ;;  %vm604_vm10 = vweird.f32 %v598_v62 }
 0x2a7   : > { %v948_v63 = vpop.eup %947  ;;  %v611_v8 = vor.u32 1.1754944e-38, %v610_v4  ;;  %vm609_vm12 = vcmp.eq.f32.partialorder %v608_v6, 8.507059e+37 }
 0x2a8   : > { %v516_v0 = vsel %vm326_vm0, %v948_v63, 0.0 }
 0x2a9   : > { %517 = vadd.xlane.f32.xlu2 %v516_v0 }
 0x2ab   : > { %v950_v1 = vpop.eup %949 }
 0x2ac   : > { %v600_v2 = vmul.f32 %v950_v1, %v598_v62  ;;  %vm605_vm9 = vweird.f32 %v950_v1 }
 0x2ad   : > { %vm606_vm11 = vmor %vm604_vm10, %vm605_vm9 }
 0x2ae   : > { %v601_v3 = vsub.f32 1.0, %v600_v2 }
 0x2b0   : > { %v602_v5 = vmul.f32 %v950_v1, %v601_v3 }
 0x2b2   : > { %v603_v7 = vadd.f32 %v950_v1, %v602_v5 }
 0x2b4   : > { %v607_v9 = vsel %vm606_vm11, %v950_v1, %v603_v7 }
 0x2b5   : > { %v612_v10 = vsel %vm609_vm12, %v611_v8, %v607_v9 }
 0x2b6   : > { %v613_v11 = vmul.f32 %v946_v56, %v612_v10 }
 0x2b8   : > { %867 = vst.msk [vmem:[%s1162_s29 + $0x18] sm:$0xff] %vm326_vm0, %v613_v11  ;;  %868 = vmatmul.msk.f32.vlgmr.msrb.gmra.mxu2 %vm326_vm0, %v613_v11 }
 0x2bc   : > { %v537_v16 = vpop.permute.xlu1 %536 }
 0x2c1   : > { %456 = vrot.lane.b32.xlu2 %v1151_v17, %s1033_s11  ;;  %s692_s11 = sshll.u32 %s689_s9, 4  ;;  %s693_s11 = int_to_ptr.hbm [resolvable:$true] %s692_s11 }
 0x2c2   : > { %s967_s14 = sshra.s32 %s693_s11, 4  ;;  %s968_s14 = int_to_ptr.hbm [resolvable:$true] %s967_s14 }
 0x2c3   : > { %s969_s21 = scalar_lea.hbm %s968_s14, 32  ;;  %p974_p1 = scmp.lt.s32.totalorder %s968_s14, %s1235_s4 }
 0x2c4   : > { %p970_p12 = scmp.ne.s32.totalorder %s968_s14, %s969_s21  ;;  %p975_p2 = scmp.lt.s32.totalorder %s973_s26, %s969_s21 }
 0x2c6   : > { %p971_p13 = pnand %p970_p12, %p1105_p4  ;;  %p976_p3 = por %p975_p2, %p974_p1 }
 0x2c8   : > { %p972_p0 = pneg %p971_p13 }
 0x2ca   : > { %p977_p5 = pnand %p976_p3, %p972_p0 }
 0x31c   : > { %v518_v12 = vpop.xlane.xlu2 %517 }
 0x31d   : > { %951 = vrcp.f32 %v518_v12  ;;  %v530_v19 = vand.u32 2147483648, %v518_v12  ;;  %v528_v21 = vand.u32 2147483647, %v518_v12  ;;  %vm524_vm14 = vweird.f32 %v518_v12 }
 0x31f   : > { %v531_v17 = vor.u32 1.1754944e-38, %v530_v19  ;;  %vm529_vm1 = vcmp.eq.f32.partialorder %v528_v21, 8.507059e+37 }
 0x323   : > { %v952_v13 = vpop.eup %951 }
 0x324   : > { %v520_v14 = vmul.f32 %v952_v13, %v518_v12  ;;  %v457_v15 = vpop.permute.xlu2 %456  ;;  %vm525_vm13 = vweird.f32 %v952_v13 }
 0x325   : > { %477 = vmatpush.msra.mxu3 %v457_v15  ;;  %vm526_vm15 = vmor %vm524_vm14, %vm525_vm13 }
 0x326   : > { %v521_v18 = vsub.f32 1.0, %v520_v14  ;;  %860 = vmatmul.msk.f32.vlgmr.msra.gmra.mxu3 %vm326_vm0, %v452_v50 }
 0x327   : > { %557 = vmatpush.msrb.mxu3 %v537_v16 }
 0x328   : > { %v522_v20 = vmul.f32 %v952_v13, %v521_v18 }
 0x32a   : > { %v523_v22 = vadd.f32 %v952_v13, %v522_v20 }
 0x32c   : > { %v527_v23 = vsel %vm526_vm15, %v952_v13, %v523_v22 }
 0x32d   : > { %v532_v24 = vsel %vm529_vm1, %v531_v17, %v527_v23 }
 0x32e   : > { %v533_v25 = vmul.f32 %v948_v63, %v532_v24 }
 0x330   : > { %863 = vst.msk [vmem:[%s1162_s29 + $0x10] sm:$0xff] %vm326_vm0, %v533_v25  ;;  %864 = vmatmul.msk.f32.vlgmr.msrb.gmra.mxu3 %vm326_vm0, %v533_v25 }
 0x33b   : > { %v639_v26 = vpop.f32.mrf.mxu2 }
 0x33c   : > { %651 = vrot.lane.b32.xlu1 %v639_v26, %s1036_s5 }
 0x3a9   : > { %v479_v27 = vpop.f32.mrf.mxu3 }
 0x3aa   : > { %643 = vrot.lane.b32.xlu2 %v479_v27, %s1037_s12 }
 0x3ab   : > { %980 = shalt.err (!%p977_p5)
}
 0x3ac   : > { %s1038_s24 = smov 128   ;;  %s1039_s6 = smov 16   ;;  %vm655_vm2 = vcmask 130048   ;;  %vm657_vm3 = vcmask 195584   ;;  %vm659_vm4 = vcmask 261120  }
 0x3ad   : > { %875 = dma.vmem_to_hbm [thread:$0]  (%p1105_p4), %s691_s10, 512, %s693_s11, %s672_s13, %s1038_s24, %s1038_s24, %s1037_s12  }
 0x3ae   : > { %s320_s9 = scalar_lea.vmem %s1234_s3, %s1122_s30  ;;  %v652_v32 = vpop.permute.xlu1 %651 }
 0x3b3   : > { %v559_v28 = vpop.f32.mrf.mxu3 }
 0x3b4   : > { %647 = vrot.lane.b32.xlu0 %v559_v28, %s1039_s6 }
 0x404   : > { %v644_v29 = vpop.permute.xlu2 %643 }
 0x405   : > { %v654_v30 = vsel %vm326_vm0, %v1168_v52, %v644_v29 }
 0x426   : > { %v648_v31 = vpop.permute.xlu0 %647 }
 0x427   : > { %v656_v33 = vsel %vm655_vm2, %v654_v30, %v648_v31 }
 0x428   : > { %v658_v34 = vsel %vm657_vm3, %v656_v33, %v652_v32 }
 0x429   : > { %660 = vst.msk [vmem:[%s320_s9] sm:$0xff] %vm659_vm4, %v658_v34 }
 0x42a PF: > { %p881_p4 = scmp.ge.s32.totalorder %s1031_s20, 2  ;;  %s720_s25 = sand.u32 1, %s1011_s15  }
 0x42b   : > { %s721_s10 = scalar_lea.sflag [#allocation3], %s720_s25 }
 0x42c   : > { %p878_p6 = pnand %p881_p4, %p1112_p8 }
 0x42e   : > { %p879_p7 = pneg %p878_p6 }
 0x430   : > { %1006 = dma.done.wait (%p879_p7), %s721_s10, 512  }
 0x431   : > { %1008 = vsyncadd (%p879_p7), %s721_s10, 4294966784  ;;  %s18_s20 = sadd.s32 1, %s1031_s20   ;;  %s1238_s15 = smov %s1015_s16 }
 0x432   : > { %p15_p9 = scmp.ge.s32.totalorder %s18_s20, 4   ;;  %s1239_s16 = smov %s1019_s17 }
 0x433   : > { %s1240_s17 = smov %s1118_s28  ;;  %s1241_s18 = smov %s1027_s19 }
 0x434   : > { %s1242_s19 = smov %s1244_s23  ;;  %17 = sbr.rel (!%p15_p9) target bundleno = 4 (0x4), region = 88 }
 0x439   :  { %727 = vsyncpa [#allocation3], 1 }
 0x43a   :  { %729 = vsyncpa [#allocation3 + $0x1], 1 }

</bundles_post_ra>
